<compile_context>
chip_gen: v7x
topology: tpu7x:2x2x1
jax: 0.10.0
libtpu: 0.0.40
codegen_flags: <defaults>
</compile_context>

<pallas_src>
import functools

import jax
import jax.numpy as jnp
import numpy as np
from jax import lax
from jax.experimental import pallas as pl
from jax.experimental.pallas import tpu as pltpu

EPS = 1e-5
GROUPS = 32
_OFF = 16   # sublane-aligned interior column offset in the bf16 conv scratch


# ---------------------------------------------------------------------------
# VMEM budgeting (generation-aware).
# ---------------------------------------------------------------------------
def _vmem_capacity_bytes():
    try:
        return int(pltpu.get_tpu_info().vmem_capacity_bytes)
    except Exception:
        return 64 << 20          # conservative default (v7x per-TC VMEM)


def _vmem_limit_bytes():
    cap = _vmem_capacity_bytes()
    return int(min(cap * 3 // 4, 100 << 20))


def _pick_tile_rows(H, W, cin, cout, budget_bytes):
    """Largest row tile whose *honest* per-step working set fits the budget
    (double-buffered input/skip/output tiles, bf16 scratch, f32 accumulator,
    live tap slices, single-buffered weights, halo rows) and divides H."""
    cskip = cin

    def step_bytes(th):
        tile = th * W
        b = 2 * tile * cin * 4                      # input tile (<=f32), 2 bufs
        b += 2 * tile * cskip * 4                   # fused skip tile, 2 bufs
        b += 2 * tile * cout * 4                    # output tile, 2 bufs
        b += (th + 2) * (_OFF + W + 1) * cin * 2    # bf16 padded scratch
        b += tile * cout * 4                        # f32 accumulator temp
        b += 2 * tile * cin * 2                     # live bf16 tap slices
        b += 9 * cin * cout * 2                     # single-buffered weights
        b += 4 * W * (cin + cskip) * 4              # halo rows, scale/shift
        return b

    th = H
    while th > 1 and step_bytes(th) > budget_bytes:
        th -= 1
    while H % th:
        th -= 1
    return max(th, 1)


# ---------------------------------------------------------------------------
# Kernel 1: per-sample, per-CHANNEL statistics (sum, sum of squares) of an
# NHWC tensor, accumulated over row tiles.  Output: (N, 2, C) f32.
# The (tiny) per-group pooling is done outside the kernel in plain XLA.
# ---------------------------------------------------------------------------
def _channel_stats_kernel(x_ref, o_ref, *, TH, W, C):
    @pl.when(pl.program_id(1) == 0)
    def _():
        o_ref[...] = jnp.zeros_like(o_ref)

    x = x_ref[0].astype(jnp.float32).reshape(TH * W, C)
    s = jnp.sum(x, axis=0, keepdims=True)              # (1, C)
    ss = jnp.sum(x * x, axis=0, keepdims=True)         # (1, C)
    o_ref[0] += jnp.concatenate([s, ss], axis=0)       # (2, C)


def _channel_stats(x_nhwc, th, vmem_limit):
    N, H, W, C = x_nhwc.shape
    nt = H // th
    kernel = functools.partial(_channel_stats_kernel, TH=th, W=W, C=C)
    return pl.pallas_call(
        kernel,
        out_shape=jax.ShapeDtypeStruct((N, 2, C), jnp.float32),
        grid=(N, nt),
        in_specs=[pl.BlockSpec((1, th, W, C), lambda n, t: (n, t, 0, 0))],
        out_specs=pl.BlockSpec((1, 2, C), lambda n, t: (n, 0, 0)),
        compiler_params=pltpu.CompilerParams(
            dimension_semantics=("parallel", "arbitrary"),
            vmem_limit_bytes=vmem_limit),
    )(x_nhwc)


def _affine_from_stats(stats, gamma, beta, count):
    """Per-channel sums -> per-sample, per-channel GN scale/shift (tiny XLA)."""
    n, _, C = stats.shape
    cpg = C // GROUPS
    s = stats[:, 0, :].reshape(n, GROUPS, cpg).sum(-1)            # (N, G)
    ss = stats[:, 1, :].reshape(n, GROUPS, cpg).sum(-1)
    mean = s / count
    var = jnp.maximum(ss / count - mean * mean, 0.0)              # clamp >= 0
    rstd = lax.rsqrt(var + EPS)
    scale = gamma[None, :] * jnp.repeat(rstd, cpg, axis=1)        # (N, C)
    shift = beta[None, :] - jnp.repeat(mean, cpg, axis=1) * scale
    return scale.reshape(n, 1, C), shift.reshape(n, 1, C)


# ---------------------------------------------------------------------------
# Kernel 2: fused  GroupNorm-apply + SiLU + Conv3x3 (pad=1)
#           [+ fused identity / 1x1-projected skip] [+ output channel stats].
# Row-tiled: grid = (N, H // TH).  The 1-pixel halo is assembled inside the
# kernel in a zero-padded bf16 VMEM scratch (interior sublane-aligned at
# column _OFF) from two tiny precomputed halo-row arrays.
# ---------------------------------------------------------------------------
def _gn_silu_conv3x3_kernel(*refs, TH, W, cin, cout, cskip, nt,
                            skip_mode, emit_stats):
    x_ref, top_ref, bot_ref, scale_ref, shift_ref, w_ref, b_ref = refs[:7]
    idx = 7
    xs_ref = ws_ref = None
    if skip_mode != "none":
        xs_ref = refs[idx]; idx += 1
    if skip_mode == "proj":
        ws_ref = refs[idx]; idx += 1
    o_ref = refs[idx]; idx += 1
    stats_ref = None
    if emit_stats:
        stats_ref = refs[idx]; idx += 1
    xp_ref = refs[idx]                      # (TH+2, _OFF+W+1, cin) bf16 scratch

    t = pl.program_id(1)
    scale = scale_ref[0]                    # (1, cin) f32
    shift = shift_ref[0]                    # (1, cin) f32

    def norm_silu(v, gate=None):
        y = v.astype(jnp.float32) * scale + shift
        y = y * pl.reciprocal(1.0 + jnp.exp(-y), approx=True)     # SiLU (EUP)
        if gate is not None:                # zero at the image border
            y = y * gate
        return y.astype(jnp.bfloat16)       # bf16 once, straight into scratch

    # Zero only the two border columns the conv actually reads.
    zero_col = jnp.zeros((TH + 2, 1, cin), jnp.bfloat16)
    xp_ref[:, _OFF - 1:_OFF, :] = zero_col
    xp_ref[:, _OFF + W:_OFF + W + 1, :] = zero_col
    # Interior (sublane-aligned full-width store) and the two halo rows.
    xp_ref[1:TH + 1, _OFF:_OFF + W, :] = norm_silu(x_ref[0])
    xp_ref[0:1, _OFF:_OFF + W, :] = norm_silu(
        top_ref[0], (t > 0).astype(jnp.float32))
    xp_ref[TH + 1:TH + 2, _OFF:_OFF + W, :] = norm_silu(
        bot_ref[0], (t < nt - 1).astype(jnp.float32))

    # 3x3 conv = nine direct-slice bf16 MXU matmuls with K = cin
    # (no (TH*W, 3*cin) im2col temporary is ever materialized).
    acc = jnp.zeros((TH * W, cout), jnp.float32)
    for dh in range(3):
        for dw in range(3):
            tap = xp_ref[dh:dh + TH, _OFF - 1 + dw:_OFF - 1 + dw + W, :]
            acc = acc + jnp.dot(tap.reshape(TH * W, cin), w_ref[dh * 3 + dw],
                                preferred_element_type=jnp.float32)
    out = acc + b_ref[...]                  # (TH*W, cout)

    if skip_mode == "proj":                 # fused 1x1 projection of the input
        xs = xs_ref[0].astype(jnp.bfloat16).reshape(TH * W, cskip)
        out = out + jnp.dot(xs, ws_ref[...], preferred_element_type=jnp.float32)
    elif skip_mode == "identity":
        out = out + xs_ref[0].astype(jnp.float32).reshape(TH * W, cout)

    o_ref[0] = out.reshape(TH, W, cout).astype(o_ref.dtype)

    if emit_stats:
        # Per-channel stats of this kernel's own output so the next GroupNorm
        # needs no extra full HBM pass over the intermediate activation.
        @pl.when(t == 0)
        def _():
            stats_ref[...] = jnp.zeros_like(stats_ref)
        s = jnp.sum(out, axis=0, keepdims=True)            # (1, cout)
        ss = jnp.sum(out * out, axis=0, keepdims=True)
        stats_ref[0] += jnp.concatenate([s, ss], axis=0)   # (2, cout)


def _gn_silu_conv3x3(x_nhwc, scale, shift, w_oihw, bias, th, vmem_limit, *,
                     skip=None, skip_w=None, emit_stats=False,
                     out_dtype=jnp.float32):
    N, H, W, cin = x_nhwc.shape
    cout = w_oihw.shape[0]
    nt = H // th

    # Weights: OIHW -> (9, cin, cout) so tap (dh, dw) is row dh*3+dw.
    w_k = jnp.transpose(w_oihw, (2, 3, 1, 0)).reshape(9, cin, cout)
    w_k = w_k.astype(jnp.bfloat16)
    b_k = bias.reshape(1, cout).astype(jnp.float32)

    # Conv halo rows (row above / below every tile; zeros at the image border).
    zrow = jnp.zeros((N, 1, W, cin), x_nhwc.dtype)
    if nt > 1:
        top = jnp.concatenate([zrow, x_nhwc[:, th - 1:H - 1:th]], axis=1)
        bot = jnp.concatenate([x_nhwc[:, th:H:th], zrow], axis=1)
    else:
        top, bot = zrow, zrow

    args = [x_nhwc, top, bot, scale, shift, w_k, b_k]
    skip_mode = "none"
    cskip = 0
    if skip is not None:
        cskip = skip.shape[-1]
        args.append(skip)
        if skip_w is not None:
            skip_mode = "proj"
            args.append(jnp.transpose(skip_w[:, :, 0, 0], (1, 0)).astype(jnp.bfloat16))
        else:
            skip_mode = "identity"

    out_shape = jax.ShapeDtypeStruct((N, H, W, cout), out_dtype)
    out_specs = pl.BlockSpec((1, th, W, cout), lambda n, t: (n, t, 0, 0))
    if emit_stats:
        out_shape = (out_shape, jax.ShapeDtypeStruct((N, 2, cout), jnp.float32))
        out_specs = (out_specs, pl.BlockSpec((1, 2, cout), lambda n, t: (n, 0, 0)))

    kernel = functools.partial(
        _gn_silu_conv3x3_kernel, TH=th, W=W, cin=cin, cout=cout, cskip=cskip,
        nt=nt, skip_mode=skip_mode, emit_stats=emit_stats)

    # Row-tile axis only accumulates (the output stats) when emit_stats.
    semantics = ("parallel", "arbitrary") if emit_stats else ("parallel", "parallel")

    def _run(const_kw):
        in_specs = [
            pl.BlockSpec((1, th, W, cin), lambda n, t: (n, t, 0, 0)),
            pl.BlockSpec((1, 1, W, cin), lambda n, t: (n, t, 0, 0)),
            pl.BlockSpec((1, 1, W, cin), lambda n, t: (n, t, 0, 0)),
            pl.BlockSpec((1, 1, cin), lambda n, t: (n, 0, 0)),
            pl.BlockSpec((1, 1, cin), lambda n, t: (n, 0, 0)),
            pl.BlockSpec((9, cin, cout), lambda n, t: (0, 0, 0), **const_kw),
            pl.BlockSpec((1, cout), lambda n, t: (0, 0), **const_kw),
        ]
        if skip_mode != "none":
            in_specs.append(pl.BlockSpec((1, th, W, cskip),
                                         lambda n, t: (n, t, 0, 0)))
        if skip_mode == "proj":
            in_specs.append(pl.BlockSpec((cskip, cout), lambda n, t: (0, 0),
                                         **const_kw))
        return pl.pallas_call(
            kernel,
            out_shape=out_shape,
            grid=(N, nt),
            in_specs=in_specs,
            out_specs=out_specs,
            scratch_shapes=[pltpu.VMEM((th + 2, _OFF + W + 1, cin), jnp.bfloat16)],
            compiler_params=pltpu.CompilerParams(
                dimension_semantics=semantics,
                vmem_limit_bytes=vmem_limit),
        )(*args)

    try:
        # Single-buffer grid-invariant operands (weights / bias / 1x1 skip
        # weights): halves their VMEM footprint (biggest win on v7x's 64 MiB).
        return _run(dict(pipeline_mode=pl.Buffered(1)))
    except Exception:
        # Fallback for jax builds without BlockSpec pipeline_mode support.
        return _run({})


# ---------------------------------------------------------------------------
# Full VAE_ResidualBlock forward.
# ---------------------------------------------------------------------------
def vae_residual_block_nhwc(x_nhwc, params, tile_rows=None, out_dtype=jnp.float32):
    N, H, W, cin = x_nhwc.shape
    cout = params["w1"].shape[0]
    assert cin % GROUPS == 0 and cout % GROUPS == 0

    vmem_limit = _vmem_limit_bytes()
    if tile_rows is None:
        th = _pick_tile_rows(H, W, max(cin, cout), cout, int(vmem_limit * 0.8))
    else:
        th = tile_rows
    assert H % th == 0

    # Keep x in the caller's dtype (bf16 inputs halve the three HBM reads of x).
    x = x_nhwc

    # Stage 1: channel stats of x, then fused GN+SiLU+conv_1 (bf16 intermediate);
    # the same kernel also emits the channel stats of its output for stage 2.
    st1 = _channel_stats(x, th, vmem_limit)
    sc1, sh1 = _affine_from_stats(st1, params["g1"].astype(jnp.float32),
                                  params["b1"].astype(jnp.float32),
                                  H * W * (cin // GROUPS))
    h, st2 = _gn_silu_conv3x3(x, sc1, sh1, params["w1"], params["bias1"], th,
                              vmem_limit, emit_stats=True,
                              out_dtype=jnp.bfloat16)

    # Stage 2: fused GN+SiLU+conv_2 with the skip connection folded in.
    sc2, sh2 = _affine_from_stats(st2, params["g2"].astype(jnp.float32),
                                  params["b2"].astype(jnp.float32),
                                  H * W * (cout // GROUPS))
    if cin == cout:
        out = _gn_silu_conv3x3(h, sc2, sh2, params["w2"], params["bias2"], th,
                               vmem_limit, skip=x, out_dtype=out_dtype)
    else:
        bias_eff = params["bias2"] + params["br"]      # fold 1x1-skip bias
        out = _gn_silu_conv3x3(h, sc2, sh2, params["w2"], bias_eff, th,
                               vmem_limit, skip=x, skip_w=params["wr"],
                               out_dtype=out_dtype)
    return out


def vae_residual_block(x_nchw, params, tile_rows=None):
    # NCHW public interface (matches PyTorch).  For stacks of residual blocks
    # call vae_residual_block_nhwc directly and skip the per-block transposes.
    x_nhwc = jnp.transpose(x_nchw, (0, 2, 3, 1))
    out = vae_residual_block_nhwc(x_nhwc, params, tile_rows)
    return jnp.transpose(out, (0, 3, 1, 2))


# ---------------------------------------------------------------------------
# Pure-JAX f32 reference (mirrors the PyTorch forward, NCHW).
# ---------------------------------------------------------------------------
def _ref_groupnorm(x, gamma, beta):
    N, C, H, W = x.shape
    cpg = C // GROUPS
    xr = x.reshape(N, GROUPS, cpg, H, W)
    mean = jnp.mean(xr, axis=(2, 3, 4), keepdims=True)
    var = jnp.mean((xr - mean) ** 2, axis=(2, 3, 4), keepdims=True)
    y = ((xr - mean) / jnp.sqrt(var + EPS)).reshape(N, C, H, W)
    return y * gamma[None, :, None, None] + beta[None, :, None, None]


def _ref_conv(x, w, b, padding):
    y = lax.conv_general_dilated(x, w, (1, 1), padding,
                                 dimension_numbers=("NCHW", "OIHW", "NCHW"))
    return y + b[None, :, None, None]


def ref_block(x, p):
    cin, cout = x.shape[1], p["w1"].shape[0]
    residue = x
    h = jax.nn.silu(_ref_groupnorm(x, p["g1"], p["b1"]))
    h = _ref_conv(h, p["w1"], p["bias1"], "SAME")
    h = jax.nn.silu(_ref_groupnorm(h, p["g2"], p["b2"]))
    h = _ref_conv(h, p["w2"], p["bias2"], "SAME")
    if cin != cout:
        residue = _ref_conv(residue, p["wr"], p["br"], "VALID")
    return h + residue


if __name__ == "__main__":
    def _make_params(key, cin, cout):
        ks = jax.random.split(key, 10)
        p = {
            "g1": 1.0 + 0.1 * jax.random.normal(ks[0], (cin,), jnp.float32),
            "b1": 0.1 * jax.random.normal(ks[1], (cin,), jnp.float32),
            "w1": 0.05 * jax.random.normal(ks[2], (cout, cin, 3, 3), jnp.float32),
            "bias1": 0.05 * jax.random.normal(ks[3], (cout,), jnp.float32),
            "g2": 1.0 + 0.1 * jax.random.normal(ks[4], (cout,), jnp.float32),
            "b2": 0.1 * jax.random.normal(ks[5], (cout,), jnp.float32),
            "w2": 0.05 * jax.random.normal(ks[6], (cout, cout, 3, 3), jnp.float32),
            "bias2": 0.05 * jax.random.normal(ks[7], (cout,), jnp.float32),
        }
        if cin != cout:
            p["wr"] = 0.05 * jax.random.normal(ks[8], (cout, cin, 1, 1), jnp.float32)
            p["br"] = 0.05 * jax.random.normal(ks[9], (cout,), jnp.float32)
        return p

    key = jax.random.PRNGKey(0)
    k0, k1, k2, k3 = jax.random.split(key, 4)

    # Tolerance is loosened vs. pure-f32 because the MXU path and the
    # intermediate activation are bf16 (f32 accumulation / stats).
    TOL = dict(atol=3e-2, rtol=3e-2)

    # Case A: in_channels != out_channels (fused 1x1 skip), 2 row tiles
    # (exercises the halo / cross-tile stats accumulation path).
    N, CIN, COUT, H, W = 2, 32, 64, 8, 8
    xA = jax.random.normal(k0, (N, CIN, H, W), jnp.float32)
    pA = _make_params(k1, CIN, COUT)
    outA = jax.block_until_ready(vae_residual_block(xA, pA, tile_rows=4))
    refA = jax.block_until_ready(ref_block(xA, pA))
    assert outA.shape == (N, COUT, H, W), outA.shape
    np.testing.assert_allclose(np.asarray(outA), np.asarray(refA), **TOL)

    # Case B: in_channels == out_channels (identity skip), auto tile sizing.
    N, C, H, W = 2, 32, 16, 16
    xB = jax.random.normal(k2, (N, C, H, W), jnp.float32)
    pB = _make_params(k3, C, C)
    outB = jax.block_until_ready(vae_residual_block(xB, pB))
    refB = jax.block_until_ready(ref_block(xB, pB))
    assert outB.shape == (N, C, H, W), outB.shape
    np.testing.assert_allclose(np.asarray(outB), np.asarray(refB), **TOL)

    print("KERNEL_OK")
</pallas_src>

<mosaic_0001>
module attributes {stable_mosaic.version = 11 : i64} {
  func.func @_channel_stats_kernel(%arg0: i32, %arg1: i32, %arg2: memref<1x4x8x32xf32, #tpu.memory_space<vmem>>, %arg3: memref<1x2x32xf32, #tpu.memory_space<vmem>>) attributes {dimension_semantics = [#tpu.dimension_semantics<parallel>, #tpu.dimension_semantics<arbitrary>], iteration_bounds = array<i64: 2, 2>, scalar_prefetch = 0 : i64, scratch_operands = 0 : i64, tpu.core_type = #tpu.core_type<tc>, window_params = [{transform_indices = @transform_0, window_bounds = array<i64: 1, 4, 8, 32>}, {transform_indices = @transform_1, window_bounds = array<i64: 1, 2, 32>}]} {
    %c0_i32 = arith.constant 0 : i32
    %0 = arith.cmpi eq, %arg1, %c0_i32 : i32
    %1 = arith.extui %0 : i1 to i32
    %c0_i32_0 = arith.constant 0 : i32
    %2 = arith.cmpi ne, %1, %c0_i32_0 : i32
    scf.if %2 {
      %cst_11 = arith.constant 0.000000e+00 : f32
      %18 = vector.broadcast %cst_11 : f32 to vector<1x2x32xf32>
      %c0_12 = arith.constant 0 : index
      %c0_13 = arith.constant 0 : index
      %c0_14 = arith.constant 0 : index
      %19 = vector.load %arg3[%c0_12, %c0_13, %c0_14] : memref<1x2x32xf32, #tpu.memory_space<vmem>>, vector<1x2x32xf32>
      tpu.vector_store %arg3[%c0_12, %c0_13, %c0_14], %18 {strides = array<i32>} : memref<1x2x32xf32, #tpu.memory_space<vmem>>, vector<1x2x32xf32>,
    } else {
    }
    %c0 = arith.constant 0 : index
    %c0_1 = arith.constant 0 : index
    %c0_2 = arith.constant 0 : index
    %c0_3 = arith.constant 0 : index
    %3 = vector.load %arg2[%c0, %c0_1, %c0_2, %c0_3] : memref<1x4x8x32xf32, #tpu.memory_space<vmem>>, vector<1x4x8x32xf32>
    %4 = vector.shape_cast %3 : vector<1x4x8x32xf32> to vector<4x8x32xf32>
    %5 = vector.shape_cast %4 : vector<4x8x32xf32> to vector<32x32xf32>
    %cst = arith.constant dense<0.000000e+00> : vector<32xf32>
    %6 = vector.multi_reduction <add>, %5, %cst [0] : vector<32x32xf32> to vector<32xf32>
    %7 = vector.shape_cast %6 : vector<32xf32> to vector<1x32xf32>
    %8 = arith.mulf %5, %5 : vector<32x32xf32>
    %cst_4 = arith.constant dense<0.000000e+00> : vector<32xf32>
    %9 = vector.multi_reduction <add>, %8, %cst_4 [0] : vector<32x32xf32> to vector<32xf32>
    %10 = vector.shape_cast %9 : vector<32xf32> to vector<1x32xf32>
    %c0_5 = arith.constant 0 : index
    %c0_6 = arith.constant 0 : index
    %c0_7 = arith.constant 0 : index
    %11 = vector.load %arg3[%c0_5, %c0_6, %c0_7] : memref<1x2x32xf32, #tpu.memory_space<vmem>>, vector<1x2x32xf32>
    %12 = vector.shape_cast %11 : vector<1x2x32xf32> to vector<2x32xf32>
    %13 = tpu.concatenate %7, %10 in 0 : vector<1x32xf32>, vector<1x32xf32> -> vector<2x32xf32>
    %14 = arith.addf %12, %13 : vector<2x32xf32>
    %c0_8 = arith.constant 0 : index
    %c0_9 = arith.constant 0 : index
    %c0_10 = arith.constant 0 : index
    %15 = vector.load %arg3[%c0_8, %c0_9, %c0_10] : memref<1x2x32xf32, #tpu.memory_space<vmem>>, vector<1x2x32xf32>
    %16 = vector.shape_cast %15 : vector<1x2x32xf32> to vector<2x32xf32>
    %17 = vector.shape_cast %14 : vector<2x32xf32> to vector<1x2x32xf32>
    tpu.vector_store %arg3[%c0_8, %c0_9, %c0_10], %17 {strides = array<i32>} : memref<1x2x32xf32, #tpu.memory_space<vmem>>, vector<1x2x32xf32>,
    return
  }
  func.func @transform_0(%arg0: i32, %arg1: i32) -> (i32, i32, i32, i32) {
    %c0_i32 = arith.constant 0 : i32
    %c0_i32_0 = arith.constant 0 : i32
    %c0_i32_1 = arith.constant 0 : i32
    return %arg0, %arg1, %c0_i32, %c0_i32_0 : i32, i32, i32, i32
  }
  func.func @transform_1(%arg0: i32, %arg1: i32) -> (i32, i32, i32) {
    %c0_i32 = arith.constant 0 : i32
    %c0_i32_0 = arith.constant 0 : i32
    %c0_i32_1 = arith.constant 0 : i32
    return %arg0, %c0_i32, %c0_i32_0 : i32, i32, i32
  }
}

</mosaic_0001>

<bundles_post_ra>
// kernel: tpu_custom_call.1
= control target key start
LH: loop header
LB: loop body
LE: loop exit
PB: predicated region body
PF: predicated region fallthrough
CT: control target
= control target key end

     0   :  { %6 = vsyncpa [#allocation3], 0  ;;  %s823_s0 = inlined_call_operand.hbm [shape: f32[2,8,8,32], index: 0, kind: input, shape index: {}]   ;;  %s824_s1 = inlined_call_operand.hbm [shape: f32[2,2,32], index: 1, kind: output, shape index: {}]  }
   0x1   :  { %8 = vsyncpa [#allocation3 + $0x1], 0 }
   0x2   :  { %9 = vsyncpa [#allocation4], 0 }
   0x3   :  { %11 = vsyncpa [#allocation4 + $0x1], 0  ;;  %s587_s6 = smov 0   ;;  %s589_s7 = smov 0  }
   0x4   :  { %s591_s8 = smov 0   ;;  %s593_s9 = smov 0  }
   0x5   :  { %s595_s10 = smov 0   ;;  %s597_s11 = smov 0  }
   0x6   :  { %s599_s12 = smov 0   ;;  %s601_s13 = smov 0  }
   0x7   :  { %s603_s14 = smov 0   ;;  %s605_s15 = smov 0  }
   0x8   :  { %s607_s16 = smov 0  }
   0x9 LB: > { %s297_s17 = sadd.s32 4294967295, %s570_s16   ;;  %s298_s18 = sadd.s32 4294967294, %s570_s16   ;;  %s570_s16 = sphi %s607_s16, %s17_s16   ;;  %s566_s15 = sphi %s605_s15, %s845_s15   ;;  %s562_s14 = sphi %s603_s14, %s844_s14   ;;  %s558_s13 = sphi %s601_s13, %s843_s13   ;;  %s554_s12 = sphi %s599_s12, %s842_s12   ;;  %s550_s11 = sphi %s597_s11, %s841_s11   ;;  %s546_s10 = sphi %s595_s10, %s840_s10   ;;  %s542_s9 = sphi %s593_s9, %s839_s9   ;;  %s538_s8 = sphi %s591_s8, %s838_s8   ;;  %s534_s7 = sphi %s589_s7, %s837_s7   ;;  %s530_s6 = sphi %s587_s6, %s836_s6  }
   0xa   : > { %s26_s19 = sadd.s32 1, %s562_s14  ;;  %s29_s20 = sadd.s32 1, %s566_s15 }
   0xb   : > { %p27_p0 = scmp.ge.s32.totalorder %s26_s19, 2  ;;  %s38_s21 = sadd.s32 1, %s550_s11 }
   0xc   : > { %p45_p1 = scmp.ne.s32.totalorder %s550_s11, %s546_s10  ;;  %p46_p2 = scmp.eq.s32.totalorder %s570_s16, 0 }
   0xd   : > { %s847_s19 = smov (%p27_p0, %s26_s19), 0  ;;  %s849_s20 = smov (!%p27_p0, %s29_s20), %s566_s15 }
   0xe   : > { %s34_s22 = ssub.s32 %s562_s14, %s847_s19  ;;  %p653_p3 = por %p46_p2, %p45_p1 }
   0xf   : > { %p31_p4 = scmp.ge.s32.totalorder %s849_s20, 2  ;;  %p51_p5 = scmp.ne.s32.totalorder %s546_s10, %s542_s9 }
  0x10   : > { %p52_p6 = scmp.eq.s32.totalorder %s297_s17, 0  ;;  %s64_s24 = sadd.s32 1, %s538_s8 }
  0x11   : > { %s851_s20 = smov (%p31_p4, %s849_s20), 0  ;;  %p74_p8 = scmp.ne.s32.totalorder %s538_s8, %s534_s7 }
  0x12   : > { %828 = sst [smem:[#allocation8_spill]] %s851_s20  ;;  %p661_p7 = por %p52_p6, %p51_p5 }
  0x13   : > { %s33_s26 = ssub.s32 %s566_s15, %s851_s20  ;;  %p75_p9 = scmp.eq.s32.totalorder %s297_s17, 3 }
  0x14   : > { %s35_s27 = sor.u32 %s34_s22, %s33_s26  ;;  %p62_p10 = scmp.eq.s32.totalorder %s33_s26, 0 }
  0x15   : > { %p36_p11 = scmp.eq.s32.totalorder %s35_s27, 0  ;;  %p669_p12 = por %p75_p9, %p74_p8 }
  0x16   : > { %s674_s29 = scalar_select %p62_p10, %s538_s8, %s64_s24  }
  0x17   : > { %s830_s28 = scalar_select %p669_p12, 1, 0 }
  0x18   : > { %s677_s30 = scalar_select %p36_p11, %s550_s11, %s38_s21  }
  0x19   : > { %p80_p13 = scmp.ne.s32.totalorder %s534_s7, %s530_s6  ;;  %p81_p0 = scmp.eq.s32.totalorder %s298_s18, 3 }
  0x1a   : > { %p325_p1 = scmp.lt.s32.totalorder %s570_s16, 4  ;;  %s101_s3 = sand.u32 1, %s550_s11  }
  0x1b   : > { %p682_p2 = por %p81_p0, %p80_p13  ;;  %s301_s4 = sshll.u32 %s101_s3, 5 }
  0x1c   : > { %s302_s5 = sshll.u32 %s562_s14, 2  ;;  %s303_s9 = sshll.u32 %s566_s15, 3 }
  0x1d   : > { %s831_s2 = scalar_select %p682_p2, 1, 0 }
  0x1e   : > { %s105_s17 = scalar_lea.vmem [#allocation2], %s301_s4  ;;  %s111_s26 = sadd.s32 %s303_s9, %s302_s5 }
  0x1f   : > { %s114_s22 = sshll.u32 %s105_s17, 4  ;;  %s304_s24 = sshll.u32 %s111_s26, 7  ;;  %s689_s22 = int_to_ptr.vmem [resolvable:$true] %s114_s22 }
  0x20   : > { %p693_p4 = pnand %p325_p1, %p653_p3  ;;  %s700_s20 = scalar_lea.hbm %s823_s0, %s304_s24 }
  0x21   : > { %s702_s4 = scalar_lea.sflag [#allocation3], %s101_s3  ;;  %s418_s5 = scalar_lea.hbm %s700_s20, 512 }
  0x22   : > { %p419_p5 = scmp.ne.s32.totalorder %s700_s20, %s418_s5  ;;  %p420_p3 = pneg %p693_p4 }
  0x23   : > { %s423_s17 = scalar_lea.hbm %s823_s0, 2048  ;;  %p424_p9 = scmp.lt.u32.totalorder %s700_s20, %s823_s0 }
  0x24   : > { %p421_p6 = pnand %p420_p3, %p419_p5  ;;  %p425_p10 = scmp.lt.u32.totalorder %s423_s17, %s418_s5 }
  0x25   : > { %p427_p13 = scmp.lt.u32.totalorder %s418_s5, %s700_s20 }
  0x26   : > { %p422_p8 = pneg %p421_p6  ;;  %p426_p11 = por %p425_p10, %p424_p9 }
  0x28   : > { %p428_p0 = por %p427_p13, %p426_p11 }
  0x2a   : > { %p429_p1 = pnand %p428_p0, %p422_p8 }
  0x2c   : > { %432 = shalt.err (!%p429_p1)
}
  0x2d   : > { %s433_s3 = scalar_lea.vmem %s689_s22, 512  ;;  %s572_s18 = smov [#allocation2]  }
  0x2e   : > { %p434_p5 = scmp.ne.s32.totalorder %s689_s22, %s433_s3  ;;  %s438_s27 = sshll.u32 %s572_s18, 4  ;;  %s439_s27 = int_to_ptr.vmem [resolvable:$false] %s438_s27 }
  0x2f   : > { %s440_s23 = scalar_lea.vmem %s439_s27, 1024  ;;  %p441_p12 = scmp.lt.s32.totalorder %s689_s22, %s439_s27 }
  0x30   : > { %p436_p6 = pnand %p434_p5, %p420_p3  ;;  %p442_p9 = scmp.lt.s32.totalorder %s440_s23, %s433_s3 }
  0x32   : > { %p437_p2 = pneg %p436_p6  ;;  %p443_p10 = por %p442_p9, %p441_p12 }
  0x34   : > { %p444_p11 = pnand %p443_p10, %p437_p2 }
  0x36   : > { %447 = shalt.err (!%p444_p11)
}
  0x37   : > { %s573_s5 = smov 128   ;;  %s574_s9 = smov 8  }
  0x38   : > { %320 = dma.hbm_to_vmem [thread:$0]  (!%p693_p4), %s700_s20, 512, %s689_s22, %s702_s4, %s573_s5, %s573_s5, %s574_s9  }
  0x39   : > { %p305_p3 = scmp.ge.s32.totalorder %s570_s16, 1  ;;  %p122_p8 = scmp.lt.s32.totalorder %s570_s16, 5 }
  0x3b   : > { %p123_p13 = pnand %p305_p3, %p122_p8 }
  0x3c   : > { %s128_s17 = sand.u32 (!%p123_p13), 1, %s546_s10  }
  0x3d   : > { %126 = sbr.rel (%p123_p13) target bundleno = 118 (0x76), region = 24  ;;  %s306_s26 = sshll.u32 (!%p123_p13), %s128_s17, 5 }
  0x3e   : > { %s129_s24 = scalar_lea.sflag (!%p123_p13), [#allocation3], %s128_s17  ;;  %s132_s3 = scalar_lea.vmem (!%p123_p13), [#allocation2], %s306_s26 }
  0x44   : > { %521 = dma.done.wait (%p661_p7), %s129_s24, 512  }
  0x45   : > { %523 = vsyncadd (%p661_p7), %s129_s24, 4294966784  ;;  %s148_s18 = sand.u32 1, %s534_s7   ;;  %p308_p12 = scmp.ne.s32.totalorder %s554_s12, 0 }
  0x46   : > { %s307_s20 = sshll.u32 %s148_s18, 1  ;;  %vm156_vm0 = vcmask (!%p308_p12), 254976   ;;  %v575_v0 = vmov (!%p308_p12), 0.0  }
  0x47   : > { %s740_s22 = scalar_lea.vmem [#allocation5], %s307_s20  ;;  %155 = sbr.rel (%p308_p12) target bundleno = 78 (0x4e), region = 32 }
  0x48   : > { %157 = vst.msk [vmem:[%s740_s22] sm:$0x3] (!%p308_p12), %vm156_vm0, %v575_v0 }
  0x4e PF: > { %v158_v1 = vld [vmem:[%s132_s3] sm:$0xff]  ;;  %v159_v2 = vld [vmem:[%s132_s3 + $0x8] sm:$0xff]  ;;  %v160_v3 = vld [vmem:[%s132_s3 + $0x10] sm:$0xff]  ;;  %vm162_vm1 = vcmask 261120   ;;  %vm194_vm2 = vcmask 1040384   ;;  %s310_s12 = sshll.u32 %s558_s13, 5 }
  0x4f   : > { %v161_v4 = vld [vmem:[%s132_s3 + $0x18] sm:$0xff]  ;;  %v163_v5 = vsel %vm162_vm1, %v158_v1, 0.0  ;;  %v164_v6 = vsel %vm162_vm1, %v159_v2, 0.0  ;;  %v166_v7 = vsel %vm162_vm1, %v160_v3, 0.0  ;;  %v176_v8 = vmul.f32 %v158_v1, %v158_v1  ;;  %v193_v35 = vld [vmem:[%s740_s22] sm:$0x3]  ;;  %s758_s27 = scalar_lea.hbm %s824_s1, %s310_s12 }
  0x50   : > { %v165_v9 = vadd.f32 %v164_v6, %v163_v5  ;;  %v177_v10 = vmul.f32 %v159_v2, %v159_v2  ;;  %v178_v11 = vmul.f32 %v160_v3, %v160_v3  ;;  %v168_v12 = vsel %vm162_vm1, %v161_v4, 0.0  ;;  %s213_s25 = sshll.u32 %s740_s22, 4  ;;  %s200_s23 = scalar_lea.sflag [#allocation4], %s148_s18  ;;  %s760_s25 = int_to_ptr.vmem [resolvable:$true] %s213_s25 }
  0x51   : > { %v179_v13 = vmul.f32 %v161_v4, %v161_v4  ;;  %v180_v14 = vsel %vm162_vm1, %v176_v8, 0.0  ;;  %vm197_vm3 = vcmask 254976   ;;  %s448_s5 = scalar_lea.vmem %s760_s25, 32  ;;  %p833_p2 = scmp.ne.s32.totalorder %s830_s28, 0 }
  0x52   : > { %v167_v15 = vadd.f32 %v166_v7, %v165_v9  ;;  %v181_v16 = vsel %vm162_vm1, %v177_v10, 0.0  ;;  %v183_v17 = vsel %vm162_vm1, %v178_v11, 0.0  ;;  %p449_p7 = scmp.ne.s32.totalorder %s760_s25, %s448_s5  ;;  %s576_s13 = smov [#allocation5]  }
  0x53   : > { %v182_v18 = vadd.f32 %v181_v16, %v180_v14  ;;  %v185_v20 = vsel %vm162_vm1, %v179_v13, 0.0  ;;  %s452_s9 = sshll.u32 %s576_s13, 4  ;;  %s453_s9 = int_to_ptr.vmem [resolvable:$false] %s452_s9 }
  0x54   : > { %v169_v19 = vadd.f32 %v168_v12, %v167_v15  ;;  %p450_p4 = pnand %p449_p7, %p833_p2  ;;  %s454_s17 = scalar_lea.vmem %s453_s9, 64 }
  0x55   : > { %v184_v21 = vadd.f32 %v183_v17, %v182_v18  ;;  %p455_p1 = scmp.lt.s32.totalorder %s760_s25, %s453_s9  ;;  %p456_p5 = scmp.lt.s32.totalorder %s454_s17, %s448_s5 }
  0x56   : > { %v170_v22 = vrot.slane %v169_v19, 4  ;;  %p451_p0 = pneg %p450_p4 }
  0x57   : > { %v186_v23 = vadd.f32 %v185_v20, %v184_v21  ;;  %p457_p6 = por %p456_p5, %p455_p1 }
  0x58   : > { %v171_v24 = vadd.f32 %v170_v22, %v169_v19 }
  0x59   : > { %v187_v25 = vrot.slane %v186_v23, 4  ;;  %p458_p9 = pnand %p457_p6, %p451_p0 }
  0x5a   : > { %v172_v26 = vrot.slane %v171_v24, 2 }
  0x5b   : > { %v188_v27 = vadd.f32 %v187_v25, %v186_v23 }
  0x5c   : > { %v173_v28 = vadd.f32 %v172_v26, %v171_v24 }
  0x5d   : > { %v189_v29 = vrot.slane %v188_v27, 2 }
  0x5e   : > { %v174_v30 = vrot.slane %v173_v28, 1 }
  0x5f   : > { %v190_v31 = vadd.f32 %v189_v29, %v188_v27 }
  0x60   : > { %v175_v32 = vadd.f32 %v174_v30, %v173_v28 }
  0x61   : > { %v191_v33 = vrot.slane %v190_v31, 1 }
  0x63   : > { %v192_v34 = vadd.f32 %v191_v33, %v190_v31 }
  0x65   : > { %v195_v36 = vsel %vm194_vm2, %v175_v32, %v192_v34 }
  0x66   : > { %v196_v37 = vadd.f32 %v195_v36, %v193_v35 }
  0x68   : > { %198 = vst.msk [vmem:[%s740_s22] sm:$0x3] %vm197_vm3, %v196_v37 }
  0x69   : > { %461 = shalt.err (!%p458_p9)
}
  0x6a   : > { %s462_s26 = scalar_lea.hbm %s758_s27, 32  ;;  %s466_s18 = scalar_lea.hbm %s824_s1, 64 }
  0x6b   : > { %p463_p10 = scmp.ne.s32.totalorder %s758_s27, %s462_s26  ;;  %p467_p8 = scmp.lt.u32.totalorder %s758_s27, %s824_s1 }
  0x6c   : > { %p468_p13 = scmp.lt.u32.totalorder %s466_s18, %s462_s26  ;;  %p470_p7 = scmp.lt.u32.totalorder %s462_s26, %s758_s27 }
  0x6d   : > { %p464_p11 = pnand %p463_p10, %p833_p2 }
  0x6e   : > { %p469_p12 = por %p468_p13, %p467_p8 }
  0x6f   : > { %p465_p3 = pneg %p464_p11 }
  0x70   : > { %p471_p4 = por %p470_p7, %p469_p12 }
  0x72   : > { %p472_p0 = pnand %p471_p4, %p465_p3 }
  0x74   : > { %475 = shalt.err (!%p472_p0)
}
  0x75   : > { %315 = dma.vmem_to_hbm [thread:$0]  (%p833_p2), %s760_s25, 32, %s758_s27, %s200_s23  }
  0x76 PF: > { %p326_p1 = scmp.ge.s32.totalorder %s570_s16, 2  ;;  %s225_s12 = sand.u32 1, %s530_s6  }
  0x77   : > { %p834_p5 = scmp.ne.s32.totalorder %s831_s2, 0  ;;  %s226_s21 = scalar_lea.sflag [#allocation4], %s225_s12 }
  0x79   : > { %p322_p6 = pnand %p326_p1, %p834_p5 }
  0x7b   : > { %525 = dma.done.wait (!%p322_p6), %s226_s21, 32  }
  0x7c   : > { %527 = vsyncadd (!%p322_p6), %s226_s21, 4294967264  ;;  %s17_s16 = sadd.s32 1, %s570_s16   ;;  %s835_s28 = sld [smem:[#allocation8_spill]] }
  0x7d   : > { %p14_p9 = scmp.ge.s32.totalorder %s17_s16, 6   ;;  %s836_s6 = smov %s534_s7 }
  0x7e   : > { %s837_s7 = smov %s538_s8  ;;  %s838_s8 = smov %s674_s29 }
  0x7f   : > { %s839_s9 = smov %s546_s10  ;;  %s840_s10 = smov %s550_s11 }
  0x80   : > { %s841_s11 = smov %s677_s30  ;;  %s842_s12 = smov %s562_s14 }
  0x81   : > { %s843_s13 = smov %s566_s15  ;;  %s844_s14 = smov %s847_s19 }
  0x82   : > { %s845_s15 = smov %s835_s28  ;;  %16 = sbr.rel (!%p14_p9) target bundleno = 9 (0x9), region = 73 }
  0x89   :  { %231 = vsyncpa [#allocation3], 1 }
  0x8a   :  { %233 = vsyncpa [#allocation3 + $0x1], 1 }
  0x8b   :  { %234 = vsyncpa [#allocation4], 1 }
  0x8c   :  { %236 = vsyncpa [#allocation4 + $0x1], 1 }

</bundles_post_ra>
